<compile_context>
chip_gen: v7x
topology: tpu7x:2x2x1
jax: 0.10.0
libtpu: 0.0.40
codegen_flags: <defaults>
</compile_context>

<pallas_src>
import jax
import jax.numpy as jnp
from jax.experimental import pallas as pl
from jax.experimental.pallas import tpu as pltpu


K_IN = 28 * 28           # 784
N_CLASSES = 10
TM_CAP = 1024            # keeps VMEM modest on v5e (16 MiB scoped) and v7x (64 MiB phys)


def mlp_kernel(x_ref, w1_ref, b1_ref, w2_ref, b2_ref,
               w3_ref, b3_ref, w4_ref, b4_ref, out_ref):
    # fc1 + relu: cast the streamed f32 x tile to bf16 in-kernel (free under the
    # DMA roofline), bf16 x bf16 -> f32 accumulate on the MXU.
    x = x_ref[...].astype(jnp.bfloat16)
    h = jnp.dot(x, w1_ref[...], preferred_element_type=jnp.float32)
    h = jnp.maximum(h + b1_ref[...], 0.0).astype(jnp.bfloat16)
    # fc2 + relu
    h = jnp.dot(h, w2_ref[...], preferred_element_type=jnp.float32)
    h = jnp.maximum(h + b2_ref[...], 0.0).astype(jnp.bfloat16)
    # fc3 + relu
    h = jnp.dot(h, w3_ref[...], preferred_element_type=jnp.float32)
    h = jnp.maximum(h + b3_ref[...], 0.0).astype(jnp.bfloat16)
    # fc4 (no relu), f32 epilogue
    z = jnp.dot(h, w4_ref[...], preferred_element_type=jnp.float32)
    z = z + b4_ref[...]
    # log_softmax along the class axis (dim=1), max-shifted for stability
    m = jnp.max(z, axis=-1, keepdims=True)
    shifted = z - m
    lse = jnp.log(jnp.sum(jnp.exp(shifted), axis=-1, keepdims=True))
    out_ref[...] = shifted - lse


def _round_up(x, m):
    return (x + m - 1) // m * m


def _choose_tm(b, tm):
    """Pick the batch tile.

    - multiple of 16 (bf16 sublane packing of the in-kernel cast)
    - capped at TM_CAP so the double-buffered f32 x tile (~6.4 MiB at 1024)
      fits comfortably under the default scoped VMEM on v5e/v6e/v7x
    - when the batch is large enough, >= 2 grid steps so the 'parallel'
      batch axis actually shards across v7x's 2 TensorCores.
    """
    if tm is not None:
        return max(16, min(_round_up(tm, 16), _round_up(b, 16)))
    tm = _round_up(pl.cdiv(b, 2), 16)       # >= 2 steps whenever b > 16
    return max(16, min(tm, TM_CAP))


def mlp_forward(x_nchw, params, tm=None):
    """x_nchw: (B, 1, 28, 28) float32 -> (B, 10) log-probabilities (float32)."""
    b = x_nchw.shape[0]
    # Row-major flatten, same as x.view(-1, num_features). No cast / no pad here.
    x_flat = x_nchw.reshape(b, K_IN)

    w1, b1, w2, b2, w3, b3, w4, b4 = params
    # bf16 weights (~0.25 MiB total, VMEM-resident); biases stay f32 and are
    # added onto the f32 MXU accumulator.
    w1 = w1.astype(jnp.bfloat16)
    w2 = w2.astype(jnp.bfloat16)
    w3 = w3.astype(jnp.bfloat16)
    w4 = w4.astype(jnp.bfloat16)

    tm = _choose_tm(b, tm)
    b_pad = _round_up(b, tm)
    if b_pad != b:
        x_flat = jnp.pad(x_flat, ((0, b_pad - b), (0, 0)))  # zero rows, sliced off below

    grid = (b_pad // tm,)

    # Weights/biases: full-array block + constant index_map -> DMA'd once and
    # kept VMEM-resident across the whole batch grid.
    def const(arr):
        nd = arr.ndim
        return pl.BlockSpec(arr.shape, lambda i, _nd=nd: (0,) * _nd)

    flops = 2 * b_pad * (K_IN * 128 + 128 * 64 + 64 * 32 + 32 * N_CLASSES)
    weight_bytes = sum(int(a.size) * a.dtype.itemsize
                       for a in (w1, b1, w2, b2, w3, b3, w4, b4))
    cost = pl.CostEstimate(
        flops=flops,
        transcendentals=2 * b_pad * N_CLASSES,
        bytes_accessed=b_pad * K_IN * 4 + weight_bytes + b_pad * N_CLASSES * 4,
    )

    out = pl.pallas_call(
        mlp_kernel,
        out_shape=jax.ShapeDtypeStruct((b_pad, N_CLASSES), jnp.float32),
        grid=grid,
        in_specs=[
            pl.BlockSpec((tm, K_IN), lambda i: (i, 0)),   # x: streamed f32 batch tiles
            const(w1), const(b1),
            const(w2), const(b2),
            const(w3), const(b3),
            const(w4), const(b4),
        ],
        out_specs=pl.BlockSpec((tm, N_CLASSES), lambda i: (i, 0)),
        compiler_params=pltpu.CompilerParams(
            dimension_semantics=("parallel",),   # shard batch across v7x's 2 TCs
        ),
        cost_estimate=cost,
    )(x_flat, w1, b1, w2, b2, w3, b3, w4, b4)

    return out[:b]


def init_params(key):
    """Deterministic init mimicking nn.Linear (uniform +/- 1/sqrt(fan_in)).
    Weights stored as (in_features, out_features), biases as (1, out_features)."""
    dims = [(K_IN, 128), (128, 64), (64, 32), (32, N_CLASSES)]
    params = []
    for (fan_in, fan_out) in dims:
        key, kw, kb = jax.random.split(key, 3)
        bound = 1.0 / (fan_in ** 0.5)
        w = jax.random.uniform(kw, (fan_in, fan_out), jnp.float32, -bound, bound)
        bias = jax.random.uniform(kb, (1, fan_out), jnp.float32, -bound, bound)
        params += [w, bias]
    return tuple(params)


if __name__ == "__main__":
    key = jax.random.PRNGKey(0)
    key, kx = jax.random.split(key)
    params = init_params(key)

    # small MNIST-like batch
    x = jax.random.normal(kx, (2, 1, 28, 28), jnp.float32)

    out = mlp_forward(x, params)
    out = jax.block_until_ready(out)

    # sanity: log_softmax rows should exp-sum to 1
    row_sums = jnp.sum(jnp.exp(out), axis=-1)
    assert out.shape == (2, 10)
    assert bool(jnp.all(jnp.abs(row_sums - 1.0) < 1e-4))
    print("KERNEL_OK")
</pallas_src>

<mosaic_0001>
module attributes {stable_mosaic.version = 11 : i64} {
  func.func @mlp_kernel(%arg0: i32, %arg1: memref<16x784xf32, #tpu.memory_space<vmem>>, %arg2: memref<784x128xbf16, #tpu.memory_space<vmem>>, %arg3: memref<1x128xf32, #tpu.memory_space<vmem>>, %arg4: memref<128x64xbf16, #tpu.memory_space<vmem>>, %arg5: memref<1x64xf32, #tpu.memory_space<vmem>>, %arg6: memref<64x32xbf16, #tpu.memory_space<vmem>>, %arg7: memref<1x32xf32, #tpu.memory_space<vmem>>, %arg8: memref<32x10xbf16, #tpu.memory_space<vmem>>, %arg9: memref<1x10xf32, #tpu.memory_space<vmem>>, %arg10: memref<16x10xf32, #tpu.memory_space<vmem>>) attributes {dimension_semantics = [#tpu.dimension_semantics<parallel>], iteration_bounds = array<i64: 1>, scalar_prefetch = 0 : i64, scratch_operands = 0 : i64, tpu.core_type = #tpu.core_type<tc>, window_params = [{transform_indices = @transform_0, window_bounds = array<i64: 16, 784>}, {pipeline_mode = #tpu.pipeline_mode<synchronous>, transform_indices = @transform_1, window_bounds = array<i64: 784, 128>}, {pipeline_mode = #tpu.pipeline_mode<synchronous>, transform_indices = @transform_2, window_bounds = array<i64: 1, 128>}, {pipeline_mode = #tpu.pipeline_mode<synchronous>, transform_indices = @transform_3, window_bounds = array<i64: 128, 64>}, {pipeline_mode = #tpu.pipeline_mode<synchronous>, transform_indices = @transform_4, window_bounds = array<i64: 1, 64>}, {pipeline_mode = #tpu.pipeline_mode<synchronous>, transform_indices = @transform_5, window_bounds = array<i64: 64, 32>}, {pipeline_mode = #tpu.pipeline_mode<synchronous>, transform_indices = @transform_6, window_bounds = array<i64: 1, 32>}, {pipeline_mode = #tpu.pipeline_mode<synchronous>, transform_indices = @transform_7, window_bounds = array<i64: 32, 10>}, {pipeline_mode = #tpu.pipeline_mode<synchronous>, transform_indices = @transform_8, window_bounds = array<i64: 1, 10>}, {transform_indices = @transform_9, window_bounds = array<i64: 16, 10>}]} {
    %c0 = arith.constant 0 : index
    %c0_0 = arith.constant 0 : index
    %0 = vector.load %arg1[%c0, %c0_0] : memref<16x784xf32, #tpu.memory_space<vmem>>, vector<16x784xf32>
    %1 = arith.truncf %0 : vector<16x784xf32> to vector<16x784xbf16>
    %c0_1 = arith.constant 0 : index
    %c0_2 = arith.constant 0 : index
    %2 = vector.load %arg2[%c0_1, %c0_2] : memref<784x128xbf16, #tpu.memory_space<vmem>>, vector<784x128xbf16>
    %cst = arith.constant dense<0.000000e+00> : vector<16x128xf32>
    %3 = tpu.matmul %1, %2, %cst {dimension_numbers = #tpu.dot_dimension_numbers<[1], [0], [0], [1], [0, 0, 1, 1], [], []>} : vector<16x784xbf16>, vector<784x128xbf16>, vector<16x128xf32> -> vector<16x128xf32>
    %c0_3 = arith.constant 0 : index
    %c0_4 = arith.constant 0 : index
    %4 = vector.load %arg3[%c0_3, %c0_4] : memref<1x128xf32, #tpu.memory_space<vmem>>, vector<1x128xf32>
    %5 = vector.broadcast %4 : vector<1x128xf32> to vector<16x128xf32>
    %6 = arith.addf %3, %5 : vector<16x128xf32>
    %cst_5 = arith.constant 0.000000e+00 : f32
    %7 = vector.broadcast %cst_5 : f32 to vector<16x128xf32>
    %8 = arith.maximumf %6, %7 : vector<16x128xf32>
    %9 = arith.truncf %8 : vector<16x128xf32> to vector<16x128xbf16>
    %c0_6 = arith.constant 0 : index
    %c0_7 = arith.constant 0 : index
    %10 = vector.load %arg4[%c0_6, %c0_7] : memref<128x64xbf16, #tpu.memory_space<vmem>>, vector<128x64xbf16>
    %cst_8 = arith.constant dense<0.000000e+00> : vector<16x64xf32>
    %11 = tpu.matmul %9, %10, %cst_8 {dimension_numbers = #tpu.dot_dimension_numbers<[1], [0], [0], [1], [0, 0, 1, 1], [], []>} : vector<16x128xbf16>, vector<128x64xbf16>, vector<16x64xf32> -> vector<16x64xf32>
    %c0_9 = arith.constant 0 : index
    %c0_10 = arith.constant 0 : index
    %12 = vector.load %arg5[%c0_9, %c0_10] : memref<1x64xf32, #tpu.memory_space<vmem>>, vector<1x64xf32>
    %13 = vector.broadcast %12 : vector<1x64xf32> to vector<16x64xf32>
    %14 = arith.addf %11, %13 : vector<16x64xf32>
    %cst_11 = arith.constant 0.000000e+00 : f32
    %15 = vector.broadcast %cst_11 : f32 to vector<16x64xf32>
    %16 = arith.maximumf %14, %15 : vector<16x64xf32>
    %17 = arith.truncf %16 : vector<16x64xf32> to vector<16x64xbf16>
    %c0_12 = arith.constant 0 : index
    %c0_13 = arith.constant 0 : index
    %18 = vector.load %arg6[%c0_12, %c0_13] : memref<64x32xbf16, #tpu.memory_space<vmem>>, vector<64x32xbf16>
    %cst_14 = arith.constant dense<0.000000e+00> : vector<16x32xf32>
    %19 = tpu.matmul %17, %18, %cst_14 {dimension_numbers = #tpu.dot_dimension_numbers<[1], [0], [0], [1], [0, 0, 1, 1], [], []>} : vector<16x64xbf16>, vector<64x32xbf16>, vector<16x32xf32> -> vector<16x32xf32>
    %c0_15 = arith.constant 0 : index
    %c0_16 = arith.constant 0 : index
    %20 = vector.load %arg7[%c0_15, %c0_16] : memref<1x32xf32, #tpu.memory_space<vmem>>, vector<1x32xf32>
    %21 = vector.broadcast %20 : vector<1x32xf32> to vector<16x32xf32>
    %22 = arith.addf %19, %21 : vector<16x32xf32>
    %cst_17 = arith.constant 0.000000e+00 : f32
    %23 = vector.broadcast %cst_17 : f32 to vector<16x32xf32>
    %24 = arith.maximumf %22, %23 : vector<16x32xf32>
    %25 = arith.truncf %24 : vector<16x32xf32> to vector<16x32xbf16>
    %c0_18 = arith.constant 0 : index
    %c0_19 = arith.constant 0 : index
    %26 = vector.load %arg8[%c0_18, %c0_19] : memref<32x10xbf16, #tpu.memory_space<vmem>>, vector<32x10xbf16>
    %cst_20 = arith.constant dense<0.000000e+00> : vector<16x10xf32>
    %27 = tpu.matmul %25, %26, %cst_20 {dimension_numbers = #tpu.dot_dimension_numbers<[1], [0], [0], [1], [0, 0, 1, 1], [], []>} : vector<16x32xbf16>, vector<32x10xbf16>, vector<16x10xf32> -> vector<16x10xf32>
    %c0_21 = arith.constant 0 : index
    %c0_22 = arith.constant 0 : index
    %28 = vector.load %arg9[%c0_21, %c0_22] : memref<1x10xf32, #tpu.memory_space<vmem>>, vector<1x10xf32>
    %29 = vector.broadcast %28 : vector<1x10xf32> to vector<16x10xf32>
    %30 = arith.addf %27, %29 : vector<16x10xf32>
    %cst_23 = arith.constant dense<0xFF800000> : vector<16xf32>
    %31 = vector.multi_reduction <maximumf>, %30, %cst_23 [1] : vector<16x10xf32> to vector<16xf32>
    %32 = vector.shape_cast %31 : vector<16xf32> to vector<16x1xf32>
    %33 = vector.broadcast %32 : vector<16x1xf32> to vector<16x10xf32>
    %34 = arith.subf %30, %33 : vector<16x10xf32>
    %35 = math.exp %34 : vector<16x10xf32>
    %cst_24 = arith.constant dense<0.000000e+00> : vector<16xf32>
    %36 = vector.multi_reduction <add>, %35, %cst_24 [1] : vector<16x10xf32> to vector<16xf32>
    %37 = vector.shape_cast %36 : vector<16xf32> to vector<16x1xf32>
    %38 = math.log %37 : vector<16x1xf32>
    %39 = vector.broadcast %38 : vector<16x1xf32> to vector<16x10xf32>
    %40 = arith.subf %34, %39 : vector<16x10xf32>
    %c0_25 = arith.constant 0 : index
    %c0_26 = arith.constant 0 : index
    %41 = vector.load %arg10[%c0_25, %c0_26] : memref<16x10xf32, #tpu.memory_space<vmem>>, vector<16x10xf32>
    tpu.vector_store %arg10[%c0_25, %c0_26], %40 {strides = array<i32>} : memref<16x10xf32, #tpu.memory_space<vmem>>, vector<16x10xf32>,
    return
  }
  func.func @transform_0(%arg0: i32) -> (i32, i32) {
    %c0_i32 = arith.constant 0 : i32
    %c0_i32_0 = arith.constant 0 : i32
    return %arg0, %c0_i32 : i32, i32
  }
  func.func @transform_1(%arg0: i32) -> (i32, i32) {
    %c0_i32 = arith.constant 0 : i32
    %c0_i32_0 = arith.constant 0 : i32
    %c0_i32_1 = arith.constant 0 : i32
    return %c0_i32, %c0_i32_0 : i32, i32
  }
  func.func @transform_2(%arg0: i32) -> (i32, i32) {
    %c0_i32 = arith.constant 0 : i32
    %c0_i32_0 = arith.constant 0 : i32
    %c0_i32_1 = arith.constant 0 : i32
    return %c0_i32, %c0_i32_0 : i32, i32
  }
  func.func @transform_3(%arg0: i32) -> (i32, i32) {
    %c0_i32 = arith.constant 0 : i32
    %c0_i32_0 = arith.constant 0 : i32
    %c0_i32_1 = arith.constant 0 : i32
    return %c0_i32, %c0_i32_0 : i32, i32
  }
  func.func @transform_4(%arg0: i32) -> (i32, i32) {
    %c0_i32 = arith.constant 0 : i32
    %c0_i32_0 = arith.constant 0 : i32
    %c0_i32_1 = arith.constant 0 : i32
    return %c0_i32, %c0_i32_0 : i32, i32
  }
  func.func @transform_5(%arg0: i32) -> (i32, i32) {
    %c0_i32 = arith.constant 0 : i32
    %c0_i32_0 = arith.constant 0 : i32
    %c0_i32_1 = arith.constant 0 : i32
    return %c0_i32, %c0_i32_0 : i32, i32
  }
  func.func @transform_6(%arg0: i32) -> (i32, i32) {
    %c0_i32 = arith.constant 0 : i32
    %c0_i32_0 = arith.constant 0 : i32
    %c0_i32_1 = arith.constant 0 : i32
    return %c0_i32, %c0_i32_0 : i32, i32
  }
  func.func @transform_7(%arg0: i32) -> (i32, i32) {
    %c0_i32 = arith.constant 0 : i32
    %c0_i32_0 = arith.constant 0 : i32
    %c0_i32_1 = arith.constant 0 : i32
    return %c0_i32, %c0_i32_0 : i32, i32
  }
  func.func @transform_8(%arg0: i32) -> (i32, i32) {
    %c0_i32 = arith.constant 0 : i32
    %c0_i32_0 = arith.constant 0 : i32
    %c0_i32_1 = arith.constant 0 : i32
    return %c0_i32, %c0_i32_0 : i32, i32
  }
  func.func @transform_9(%arg0: i32) -> (i32, i32) {
    %c0_i32 = arith.constant 0 : i32
    %c0_i32_0 = arith.constant 0 : i32
    return %arg0, %c0_i32 : i32, i32
  }
}

</mosaic_0001>

<bundles_post_ra>
// kernel: tpu_custom_call.1
= control target key start
LH: loop header
LB: loop body
LE: loop exit
PB: predicated region body
PF: predicated region fallthrough
CT: control target
= control target key end

     0   :  { %14 = vsyncpa [#allocation3], 0  ;;  %s1488_s0 = inlined_call_operand.vmem [shape: f32[16,784], index: 0, kind: input, shape index: {}]   ;;  %s1489_s1 = inlined_call_operand.hbm [shape: bf16[784,128], index: 1, kind: input, shape index: {}]   ;;  %s1490_s2 = inlined_call_operand.vmem [shape: f32[1,128], index: 2, kind: input, shape index: {}]   ;;  %s1491_s3 = inlined_call_operand.vmem [shape: bf16[128,64], index: 3, kind: input, shape index: {}]   ;;  %s1492_s4 = inlined_call_operand.vmem [shape: f32[1,64], index: 4, kind: input, shape index: {}]   ;;  %s1493_s5 = inlined_call_operand.vmem [shape: bf16[64,32], index: 5, kind: input, shape index: {}]   ;;  %s1494_s6 = inlined_call_operand.vmem [shape: f32[1,32], index: 6, kind: input, shape index: {}]   ;;  %s1495_s7 = inlined_call_operand.vmem [shape: bf16[32,10], index: 7, kind: input, shape index: {}]   ;;  %s1496_s8 = inlined_call_operand.vmem [shape: f32[1,10], index: 8, kind: input, shape index: {}]   ;;  %s1497_s9 = inlined_call_operand.hbm [shape: f32[16,10], index: 9, kind: output, shape index: {}]  }
   0x1   :  { %15 = vsyncpa [#allocation4], 0  ;;  %s1281_s30 = smov [#allocation2]   ;;  %s1233_s13 = scalar_lea.hbm %s1489_s1, 6272 }
   0x2   :  { %s23_s10 = sshll.u32 %s1281_s30, 4  ;;  %p1234_p0 = scmp.ne.s32.totalorder %s1489_s1, %s1233_s13  ;;  %s24_s10 = int_to_ptr.vmem [resolvable:$true] %s23_s10 }
   0x3   :  { %p1237_p1 = scmp.lt.u32.totalorder %s1233_s13, %s1489_s1 }
   0x5   :  { %p1239_p2 = pnand %p1237_p1, %p1234_p0 }
   0x7   :  { %1242 = shalt.err (!%p1239_p2)
}
   0x8   :  { %s1243_s18 = scalar_lea.vmem %s24_s10, 6272  ;;  %p1248_p4 = scmp.lt.s32.totalorder %s24_s10, %s24_s10 }
   0x9   :  { %p1244_p3 = scmp.ne.s32.totalorder %s24_s10, %s1243_s18  ;;  %p1249_p5 = scmp.lt.s32.totalorder %s1243_s18, %s1243_s18 }
   0xb   :  { %p1250_p6 = por %p1249_p5, %p1248_p4 }
   0xd   :  { %p1251_p7 = pnand %p1250_p6, %p1244_p3 }
   0xf   :  { %1254 = shalt.err (!%p1251_p7)
}
  0x10   :  { %s1282_s19 = smov 64   ;;  %s1283_s20 = smov 4  }
  0x11   :  { %29 = dma.hbm_to_vmem [thread:$0]  %s1489_s1, 6272, %s24_s10, [#allocation3], %s1282_s19, %s1282_s19, %s1283_s20  }
  0x12   :  { %1277 = dma.done.wait [#allocation3], 6272  }
  0x13   :  { %1278 = vsyncadd [#allocation3], 4294961024  ;;  %v1162_v0 = vld [vmem:[#allocation2 + $0x40] sm:$0xff]   ;;  %v1166_v4 = vld [vmem:[#allocation2 + $0x48] sm:$0xff]   ;;  %v1284_v43 = vmov 0.0   ;;  %vm1285_vm0 = vmmov 0  }
  0x14   :  { %v1163_v1 = vld [vmem:[#allocation2] sm:$0xff]   ;;  %1023 = vmatprep.subr.bf16.mxu0 %v1162_v0  ;;  %v1167_v5 = vld [vmem:[#allocation2 + $0x8] sm:$0xff]   ;;  %v1170_v8 = vld [vmem:[#allocation2 + $0x50] sm:$0xff]   ;;  %vm468_vm1 = vcmask 130048   ;;  %vm793_vm2 = vcmask 523264   ;;  %vm864_vm3 = vcmask 261120  }
  0x15   :  { %v1164_v2 = vld [vmem:[#allocation2 + $0xc0] sm:$0xff]   ;;  %1024 = vmatpush3.bf16.msra.mxu0 %v1163_v1  ;;  %v1168_v6 = vld [vmem:[#allocation2 + $0xc8] sm:$0xff]   ;;  %v1171_v9 = vld [vmem:[#allocation2 + $0x10] sm:$0xff]   ;;  %vm909_vm4 = vcmask 80896  }
  0x16   :  { %v1165_v3 = vld [vmem:[#allocation2 + $0x80] sm:$0xff]   ;;  %1045 = vmatprep.subr.bf16.mxu1 %v1164_v2  ;;  %1025 = vmatprep.subr.bf16.mxu0 %v1166_v4  ;;  %v1169_v7 = vld [vmem:[#allocation2 + $0x88] sm:$0xff]   ;;  %v1172_v10 = vld [vmem:[#allocation2 + $0xd0] sm:$0xff]  }
  0x17   :  { %1046 = vmatpush3.bf16.msra.mxu1 %v1165_v3  ;;  %v1173_v11 = vld [vmem:[#allocation2 + $0x90] sm:$0xff]   ;;  %v1174_v12 = vld [vmem:[#allocation2 + $0x58] sm:$0xff]   ;;  %v1178_v16 = vld [vmem:[#allocation2 + $0x60] sm:$0xff]  }
  0x18   :  { %1047 = vmatprep.subr.bf16.mxu1 %v1168_v6  ;;  %v1175_v13 = vld [vmem:[#allocation2 + $0x18] sm:$0xff]   ;;  %v1179_v17 = vld [vmem:[#allocation2 + $0x20] sm:$0xff]   ;;  %v1182_v20 = vld [vmem:[#allocation2 + $0x68] sm:$0xff]  }
  0x19   :  { %1026 = vmatpush3.bf16.msra.mxu0 %v1167_v5  ;;  %v1176_v14 = vld [vmem:[#allocation2 + $0xd8] sm:$0xff]   ;;  %v1180_v18 = vld [vmem:[#allocation2 + $0xe0] sm:$0xff]   ;;  %v1183_v21 = vld [vmem:[#allocation2 + $0x28] sm:$0xff]  }
  0x1a   :  { %1027 = vmatprep.subr.bf16.mxu0 %v1170_v8  ;;  %v1177_v15 = vld [vmem:[#allocation2 + $0x98] sm:$0xff]   ;;  %v1181_v19 = vld [vmem:[#allocation2 + $0xa0] sm:$0xff]   ;;  %v1184_v22 = vld [vmem:[#allocation2 + $0xe8] sm:$0xff]  }
  0x1b   :  { %1048 = vmatpush3.bf16.msra.mxu1 %v1169_v7  ;;  %v1185_v23 = vld [vmem:[#allocation2 + $0xa8] sm:$0xff]   ;;  %v1186_v24 = vld [vmem:[#allocation2 + $0x70] sm:$0xff]   ;;  %v1190_v28 = vld [vmem:[#allocation2 + $0x78] sm:$0xff]  }
  0x1c   :  { %1049 = vmatprep.subr.bf16.mxu1 %v1172_v10  ;;  %v1187_v25 = vld [vmem:[#allocation2 + $0x30] sm:$0xff]   ;;  %v1191_v29 = vld [vmem:[#allocation2 + $0x38] sm:$0xff]   ;;  %v49_v31 = vld [vmem:[%s1488_s0 + $0x8] sm:$0xff] }
  0x1d   :  { %1028 = vmatpush3.bf16.msra.mxu0 %v1171_v9  ;;  %v1188_v26 = vld [vmem:[#allocation2 + $0xf0] sm:$0xff]   ;;  %v1192_v30 = vld [vmem:[#allocation2 + $0xf8] sm:$0xff]   ;;  %v56_v32 = vld [vmem:[%s1488_s0 + $0x40] sm:$0xff] }
  0x1e   :  { %1029 = vmatprep.subr.bf16.mxu0 %v1174_v12  ;;  %v1189_v27 = vld [vmem:[#allocation2 + $0xb0] sm:$0xff]   ;;  %v63_v33 = vpack.c.bf16 %v56_v32, %v49_v31  ;;  %v1193_v34 = vld [vmem:[#allocation2 + $0xb8] sm:$0xff]   ;;  %v48_v35 = vld [vmem:[%s1488_s0] sm:$0xff] }
  0x1f   :  { %1050 = vmatpush3.bf16.msra.mxu1 %v1173_v11  ;;  %v55_v36 = vld [vmem:[%s1488_s0 + $0x38] sm:$0xff]  ;;  %v1194_v38 = vld [vmem:[#allocation2 + $0x140] sm:$0xff]   ;;  %v58_v40 = vld [vmem:[%s1488_s0 + $0x50] sm:$0xff] }
  0x20   :  { %1051 = vmatprep.subr.bf16.mxu1 %v1176_v14  ;;  %504 = vmatprep.mubr.bf16.mxu0 %v63_v33  ;;  %v62_v37 = vpack.c.bf16 %v55_v36, %v48_v35  ;;  %v51_v39 = vld [vmem:[%s1488_s0 + $0x18] sm:$0xff]  ;;  %v1195_v42 = vld [vmem:[#allocation2 + $0x100] sm:$0xff]   ;;  %v50_v44 = vld [vmem:[%s1488_s0 + $0x10] sm:$0xff] }
  0x21   :  { %1030 = vmatpush3.bf16.msra.mxu0 %v1175_v13  ;;  %v65_v41 = vpack.c.bf16 %v58_v40, %v51_v39  ;;  %v57_v45 = vld [vmem:[%s1488_s0 + $0x48] sm:$0xff]  ;;  %v1198_v49 = vld [vmem:[#allocation2 + $0x150] sm:$0xff]   ;;  %v1200_v51 = vld [vmem:[#allocation2 + $0x158] sm:$0xff]  }
  0x22   :  { %1031 = vmatprep.subr.bf16.mxu0 %v1178_v16  ;;  %v64_v46 = vpack.c.bf16 %v57_v45, %v50_v44  ;;  %v1196_v47 = vld [vmem:[#allocation2 + $0x148] sm:$0xff]   ;;  %v1199_v50 = vld [vmem:[#allocation2 + $0x110] sm:$0xff]   ;;  %v1201_v52 = vld [vmem:[#allocation2 + $0x118] sm:$0xff]  }
  0x23   :  { %1052 = vmatpush3.bf16.msra.mxu1 %v1177_v15  ;;  %545 = vmatprep.mubr.bf16.mxu1 %v65_v41  ;;  %v1197_v48 = vld [vmem:[#allocation2 + $0x108] sm:$0xff]   ;;  %v1202_v53 = vld [vmem:[#allocation2 + $0x160] sm:$0xff]   ;;  %v1206_v59 = vld [vmem:[#allocation2 + $0x170] sm:$0xff]  }
  0x24   :  { %1053 = vmatprep.subr.bf16.mxu1 %v1180_v18  ;;  %v1203_v54 = vld [vmem:[#allocation2 + $0x120] sm:$0xff]   ;;  %v1204_v55 = vld [vmem:[#allocation2 + $0x168] sm:$0xff]   ;;  %v54_v62 = vld [vmem:[%s1488_s0 + $0x30] sm:$0xff] }
  0x25   :  { %1032 = vmatpush3.bf16.msra.mxu0 %v1179_v17  ;;  %v1210_v56 = vld [vmem:[#allocation2 + $0x180] sm:$0xff]   ;;  %v53_v57 = vld [vmem:[%s1488_s0 + $0x28] sm:$0xff]  ;;  %v1207_v1 = vld [vmem:[#allocation2 + $0x130] sm:$0xff]  }
  0x26   :  { %1033 = vmatprep.subr.bf16.mxu0 %v1182_v20  ;;  %v1205_v58 = vld [vmem:[#allocation2 + $0x128] sm:$0xff]   ;;  %v60_v60 = vld [vmem:[%s1488_s0 + $0x60] sm:$0xff]  ;;  %v1208_v2 = vld [vmem:[#allocation2 + $0x178] sm:$0xff]  }
  0x27   :  { %1054 = vmatpush3.bf16.msra.mxu1 %v1181_v19  ;;  %v67_v61 = vpack.c.bf16 %v60_v60, %v53_v57  ;;  %v61_v63 = vld [vmem:[%s1488_s0 + $0x68] sm:$0xff]  ;;  %v1209_v3 = vld [vmem:[#allocation2 + $0x138] sm:$0xff]   ;;  %v52_v4 = vld [vmem:[%s1488_s0 + $0x20] sm:$0xff] }
  0x28   :  { %1055 = vmatprep.subr.bf16.mxu1 %v1184_v22  ;;  %v68_v0 = vpack.c.bf16 %v61_v63, %v54_v62  ;;  %v59_v5 = vld [vmem:[%s1488_s0 + $0x58] sm:$0xff]  ;;  %v1211_v7 = vld [vmem:[%s1491_s3] sm:$0xff]   ;;  %v1212_v8 = vld [vmem:[%s1491_s3 + $0x8] sm:$0xff]  }
  0x29   :  { %1034 = vmatpush3.bf16.msra.mxu0 %v1183_v21  ;;  %v66_v6 = vpack.c.bf16 %v59_v5, %v52_v4  ;;  %v1213_v9 = vld [vmem:[%s1491_s3 + $0x10] sm:$0xff]   ;;  %v1214_v10 = vld [vmem:[%s1491_s3 + $0x18] sm:$0xff]   ;;  %v1215_v11 = vld [vmem:[%s1491_s3 + $0x20] sm:$0xff]  }
  0x2a   :  { %1035 = vmatprep.subr.bf16.mxu0 %v1186_v24  ;;  %v1216_v12 = vld [vmem:[%s1491_s3 + $0x28] sm:$0xff]   ;;  %v1217_v13 = vld [vmem:[%s1491_s3 + $0x30] sm:$0xff]   ;;  %v1218_v14 = vld [vmem:[%s1491_s3 + $0x38] sm:$0xff]  }
  0x2b   :  { %1056 = vmatpush3.bf16.msra.mxu1 %v1185_v23  ;;  %v1219_v15 = vld [vmem:[%s1493_s5] sm:$0xff]   ;;  %v1220_v16 = vld [vmem:[%s1493_s5 + $0x8] sm:$0xff]  }
  0x2c   :  { %1057 = vmatprep.subr.bf16.mxu1 %v1188_v26  ;;  %v953_v18 = vld [vmem:[%s1490_s2] ss:$0 sm:$0xff] }
  0x2d   :  { %1036 = vmatpush3.bf16.msra.mxu0 %v1187_v25 }
  0x2e   :  { %1037 = vmatprep.subr.bf16.mxu0 %v1190_v28 }
  0x2f   :  { %1058 = vmatpush3.bf16.msra.mxu1 %v1189_v27 }
  0x30   :  { %1059 = vmatprep.subr.bf16.mxu1 %v1192_v30 }
  0x31   :  { %1038 = vmatpush3.bf16.msra.mxu0 %v1191_v29 }
  0x32   :  { %1067 = vmatprep.subr.bf16.mxu0 %v1194_v38 }
  0x33   :  { %1060 = vmatpush3.bf16.msra.mxu1 %v1193_v34 }
  0x34   :  { %1108 = vmatprep.subr.bf16.mxu1 %v1284_v43  ;;  %505 = vmatmul.mubr.bf16.vlgmr.msra.gmra.mrb[0].mxu0 %v62_v37 }
  0x35   :  { %1068 = vmatpush3.bf16.msra.mxu0 %v1195_v42  ;;  %586 = vmatprep.mubr.bf16.mxu0 %v67_v61 }
  0x36   :  { %546 = vmatmul.mubr.bf16.vlgmr.msra.gmra.mrb[0].mxu1 %v64_v46  ;;  %1069 = vmatprep.subr.bf16.mxu0 %v1196_v47 }
  0x37   :  { %1110 = vmatprep.mubr.msk.bf16.mxu1 %vm1285_vm0, %v1284_v43  ;;  %1109 = vmatpush3.bf16.msra.mxu1 %v1210_v56 }
  0x38   :  { %1114 = vmatprep.subr.bf16.mxu1 %v1284_v43 }
  0x39   :  { %1070 = vmatpush3.bf16.msra.mxu0 %v1197_v48 }
  0x3a   :  { %1071 = vmatprep.subr.bf16.mxu0 %v1198_v49 }
  0x3d   :  { %1072 = vmatpush3.bf16.msra.mxu0 %v1199_v50 }
  0x3e   :  { %1073 = vmatprep.subr.bf16.mxu0 %v1200_v51  ;;  %1111 = vmatmul.mubr.msk.bf16.vlgmr.msra.gmra.mrb[4].mxu1 %vm468_vm1, %v68_v0  ;;  %v1223_v0 = vld [vmem:[%s1495_s7] sm:$0xff]  }
  0x3f   :  { %1130 = vmatprep.mubr.msk.bf16.mxu1 %vm1285_vm0, %v1284_v43  ;;  %1115 = vmatpush3.bf16.msra.mxu1 %v1211_v7 }
  0x40   :  { %1116 = vmatprep.subr.bf16.mxu1 %v1284_v43 }
  0x41   :  { %1074 = vmatpush3.bf16.msra.mxu0 %v1201_v52  ;;  %v1221_v52 = vld [vmem:[%s1493_s5 + $0x10] sm:$0xff]  }
  0x42   :  { %1075 = vmatprep.subr.bf16.mxu0 %v1202_v53  ;;  %v1222_v53 = vld [vmem:[%s1493_s5 + $0x18] sm:$0xff]  }
  0x43   :  { %1117 = vmatpush3.bf16.msra.mxu1 %v1212_v8 }
  0x44   :  { %1118 = vmatprep.subr.bf16.mxu1 %v1284_v43 }
  0x45   :  { %1076 = vmatpush3.bf16.msra.mxu0 %v1203_v54  ;;  %v1004_v54 = vld [vmem:[%s1492_s4] ss:$0 sm:$0xff] }
  0x46   :  { %1077 = vmatprep.subr.bf16.mxu0 %v1204_v55 }
  0x47   :  { %1119 = vmatpush3.bf16.msra.mxu1 %v1213_v9 }
  0x48   :  { %1120 = vmatprep.subr.bf16.mxu1 %v1284_v43 }
  0x49   :  { %1078 = vmatpush3.bf16.msra.mxu0 %v1205_v58 }
  0x4a   :  { %1079 = vmatprep.subr.bf16.mxu0 %v1206_v59 }
  0x4b   :  { %1121 = vmatpush3.bf16.msra.mxu1 %v1214_v10 }
  0x4c   :  { %1122 = vmatprep.subr.bf16.mxu1 %v1284_v43 }
  0x4d   :  { %1080 = vmatpush3.bf16.msra.mxu0 %v1207_v1  ;;  %v1224_v1 = vld [vmem:[%s1495_s7 + $0x8] sm:$0xff]  }
  0x4e   :  { %1081 = vmatprep.subr.bf16.mxu0 %v1208_v2  ;;  %v1013_v2 = vld [vmem:[%s1494_s6] ss:$0 sm:$0xff]  ;;  %s1286_s6 = smov [#allocation5]  }
  0x4f   :  { %1123 = vmatpush3.bf16.msra.mxu1 %v1215_v11  ;;  %s941_s7 = sshll.u32 %s1286_s6, 4  ;;  %s942_s7 = int_to_ptr.vmem [resolvable:$true] %s941_s7 }
  0x50   :  { %1124 = vmatprep.subr.bf16.mxu1 %v1284_v43  ;;  %p1260_p9 = scmp.lt.s32.totalorder %s942_s7, %s942_s7 }
  0x51   :  { %1082 = vmatpush3.bf16.msra.mxu0 %v1209_v3 }
  0x52   :  { %1134 = vmatprep.subr.bf16.mxu0 %v1284_v43 }
  0x53   :  { %1125 = vmatpush3.bf16.msra.mxu1 %v1216_v12 }
  0x54   :  { %587 = vmatmul.mubr.bf16.vlgmr.msra.gmra.mrb[4].mxu0 %v66_v6  ;;  %1126 = vmatprep.subr.bf16.mxu1 %v1284_v43 }
  0x55   :  { %1142 = vmatprep.mubr.msk.bf16.mxu0 %vm1285_vm0, %v1284_v43  ;;  %1135 = vmatpush3.bf16.msra.mxu0 %v1219_v15 }
  0x56   :  { %1136 = vmatprep.subr.bf16.mxu0 %v1284_v43 }
  0x57   :  { %1127 = vmatpush3.bf16.msra.mxu1 %v1217_v13 }
  0x58   :  { %1128 = vmatprep.subr.bf16.mxu1 %v1284_v43 }
  0x59   :  { %1137 = vmatpush3.bf16.msra.mxu0 %v1220_v16 }
  0x5a   :  { %1138 = vmatprep.subr.bf16.mxu0 %v1284_v43 }
  0x5b   :  { %1129 = vmatpush3.bf16.msra.mxu1 %v1218_v14 }
  0x5c   :  { %1146 = vmatprep.subr.bf16.mxu1 %v1284_v43 }
  0x5d   :  { %1139 = vmatpush3.bf16.msra.mxu0 %v1221_v52 }
  0x5e   :  { %1140 = vmatprep.subr.bf16.mxu0 %v1284_v43 }
  0x61   :  { %1141 = vmatpush3.bf16.msra.mxu0 %v1222_v53 }
 0x107   :  { %v1039_v17 = vpop.f32.mrb[0].mxu0 }
 0x108   :  { %v1040_v19 = vpop.f32.mrb[1].mxu0 }
 0x109   :  { %v1041_v20 = vadd.f32 %v1040_v19, %v1039_v17  ;;  %v1042_v21 = vpop.f32.mrb[2].mxu0  ;;  %v1061_v22 = vpop.f32.mrb[0].mxu1 }
 0x10a   :  { %v1043_v23 = vpop.f32.mrb[3].mxu0  ;;  %v1062_v26 = vpop.f32.mrb[1].mxu1 }
 0x10b   :  { %v507_v24 = vadd.f32 %v1041_v20, %v953_v18  ;;  %v1044_v25 = vadd.f32 %v1043_v23, %v1042_v21  ;;  %v1063_v27 = vadd.f32 %v1062_v26, %v1061_v22  ;;  %v1064_v28 = vpop.f32.mrb[2].mxu1 }
 0x10c   :  { %v1065_v30 = vpop.f32.mrb[3].mxu1 }
 0x10d   :  { %v510_v29 = vadd.f32 %v1044_v25, %v953_v18  ;;  %v548_v31 = vadd.f32 %v1063_v27, %v507_v24  ;;  %v1066_v32 = vadd.f32 %v1065_v30, %v1064_v28 }
 0x10f   :  { %v551_v33 = vadd.f32 %v1066_v32, %v510_v29 }
 0x111   :  { %v629_v34 = vpop.f32.mrb[4].mxu1 }
 0x112   :  { %v1112_v35 = vpop.f32.mrb[5].mxu1 }
 0x113   :  { %v632_v36 = vpop.f32.mrb[6].mxu1 }
 0x114   :  { %v1113_v37 = vpop.f32.mrb[7].mxu1 }
 0x127   :  { %v1083_v38 = vpop.f32.mrb[4].mxu0 }
 0x128   :  { %v1084_v39 = vpop.f32.mrb[5].mxu0 }
 0x129   :  { %v1085_v40 = vadd.f32 %v1084_v39, %v1083_v38  ;;  %v1086_v41 = vpop.f32.mrb[6].mxu0 }
 0x12a   :  { %v1087_v42 = vpop.f32.mrb[7].mxu0 }
 0x12b   :  { %v589_v44 = vadd.f32 %v1085_v40, %v548_v31  ;;  %v1088_v45 = vadd.f32 %v1087_v42, %v1086_v41 }
 0x12d   :  { %v630_v46 = vadd.f32 %v629_v34, %v589_v44  ;;  %v592_v47 = vadd.f32 %v1088_v45, %v551_v33 }
 0x12f   :  { %v633_v48 = vadd.f32 %v632_v36, %v592_v47  ;;  %v636_v49 = vmax.f32 %v630_v46, 0.0 }
 0x131   :  { %v637_v50 = vmax.f32 %v633_v48, 0.0 }
 0x133   :  { %v638_v51 = vpack.c.bf16 %v637_v50, %v636_v49 }
 0x135   :  { %1131 = vmatmul.mubr.bf16.vlgmr.msra.gmra.mrb[8].mxu1 %v638_v51 }
 0x136   :  { %1150 = vmatprep.mubr.msk.bf16.mxu1 %vm1285_vm0, %v1284_v43  ;;  %1147 = vmatpush3.bf16.msra.mxu1 %v1223_v0 }
 0x137   :  { %1148 = vmatprep.subr.bf16.mxu1 %v1284_v43  ;;  %v1019_v43 = vld [vmem:[%s1496_s8] ss:$0 sm:$0xff]  ;;  %s1255_s8 = scalar_lea.vmem %s942_s7, 256 }
 0x138   :  { %p1256_p8 = scmp.ne.s32.totalorder %s942_s7, %s1255_s8  ;;  %p1261_p10 = scmp.lt.s32.totalorder %s1255_s8, %s1255_s8 }
 0x13a   :  { %1149 = vmatpush3.bf16.msra.mxu1 %v1224_v1  ;;  %p1262_p11 = por %p1261_p10, %p1260_p9 }
 0x13c   :  { %p1263_p12 = pnand %p1262_p11, %p1256_p8 }
 0x208   :  { %v744_v55 = vpop.f32.mrb[8].mxu1 }
 0x209   :  { %v745_v56 = vadd.f32 %v1004_v54, %v744_v55  ;;  %v1132_v57 = vpop.f32.mrb[9].mxu1 }
 0x20a   :  { %v747_v58 = vpop.f32.mrb[10].mxu1 }
 0x20b   :  { %v748_v59 = vadd.f32 %v1004_v54, %v747_v58  ;;  %v1133_v60 = vpop.f32.mrb[11].mxu1  ;;  %v751_v61 = vmax.f32 %v745_v56, 0.0 }
 0x20d   :  { %v752_v62 = vmax.f32 %v748_v59, 0.0 }
 0x20f   :  { %v753_v63 = vpack.c.bf16 %v752_v62, %v751_v61 }
 0x211   :  { %1143 = vmatmul.mubr.msk.bf16.vlgmr.msra.gmra.mrb[8].mxu0 %vm793_vm2, %v753_v63 }
 0x2e4   :  { %v831_v3 = vpop.f32.mrb[8].mxu0 }
 0x2e5   :  { %v832_v4 = vadd.f32 %v1013_v2, %v831_v3  ;;  %v1144_v5 = vpop.f32.mrb[9].mxu0 }
 0x2e6   :  { %v834_v6 = vpop.f32.mrb[10].mxu0 }
 0x2e7   :  { %v835_v7 = vadd.f32 %v1013_v2, %v834_v6  ;;  %v1145_v8 = vpop.f32.mrb[11].mxu0  ;;  %v838_v9 = vmax.f32 %v832_v4, 0.0 }
 0x2e9   :  { %v839_v10 = vmax.f32 %v835_v7, 0.0 }
 0x2eb   :  { %v840_v11 = vpack.c.bf16 %v839_v10, %v838_v9 }
 0x2ed   :  { %1151 = vmatmul.mubr.msk.bf16.vlgmr.msra.gmra.mrb[12].mxu1 %vm864_vm3, %v840_v11 }
 0x3c0   :  { %v902_v12 = vpop.f32.mrb[12].mxu1 }
 0x3c1   :  { %v903_v13 = vadd.f32 %v1019_v43, %v902_v12  ;;  %v1152_v14 = vpop.f32.mrb[13].mxu1 }
 0x3c2   :  { %v905_v15 = vpop.f32.mrb[14].mxu1 }
 0x3c3   :  { %v906_v16 = vadd.f32 %v1019_v43, %v905_v15  ;;  %v1153_v17 = vpop.f32.mrb[15].mxu1  ;;  %v910_v18 = vsel %vm909_vm4, %v903_v13, -inf }
 0x3c4   :  { %911 = vmax.xlane.f32.xlu0 %v910_v18 }
 0x3c5   :  { %v913_v19 = vsel %vm909_vm4, %v906_v16, -inf }
 0x3c8   :  { %914 = vmax.xlane.f32.xlu0 %v913_v19 }
 0x451   :  { %v912_v20 = vpop.xlane.xlu0 %911 }
 0x452   :  { %v916_v21 = vsub.f32 %v903_v13, %v912_v20 }
 0x454   :  { %v918_v22 = vmul.f32 1.442695, %v916_v21 }
 0x455   :  { %v915_v23 = vpop.xlane.xlu0 %914 }
 0x456   :  { %1225 = vpow2.f32 %v918_v22  ;;  %v917_v24 = vsub.f32 %v906_v16, %v915_v23 }
 0x458   :  { %v920_v25 = vmul.f32 1.442695, %v917_v24 }
 0x45a   :  { %1227 = vpow2.f32 %v920_v25 }
 0x460   :  { %v1226_v26 = vpop.eup %1225 }
 0x461   :  { %v922_v27 = vsel %vm909_vm4, %v1226_v26, 0.0 }
 0x462   :  { %923 = vadd.xlane.f32.xlu1 %v922_v27 }
 0x464   :  { %v1228_v28 = vpop.eup %1227 }
 0x465   :  { %v925_v29 = vsel %vm909_vm4, %v1228_v28, 0.0 }
 0x466   :  { %926 = vadd.xlane.f32.xlu1 %v925_v29 }
 0x4ef   :  { %v924_v30 = vpop.xlane.xlu1 %923 }
 0x4f0   :  { %1229 = vlog2.f32 %v924_v30 }
 0x4f3   :  { %v927_v31 = vpop.xlane.xlu1 %926 }
 0x4f4   :  { %1231 = vlog2.f32 %v927_v31 }
 0x4fa   :  { %v1230_v32 = vpop.eup %1229 }
 0x4fb   :  { %v929_v33 = vmul.f32 0.6931472, %v1230_v32 }
 0x4fd   :  { %v932_v34 = vsub.f32 %v916_v21, %v929_v33 }
 0x4fe   :  { %v1232_v35 = vpop.eup %1231 }
 0x4ff   :  { %934 = vst.msk [vmem:[#allocation5] sm:$0xff] %vm909_vm4, %v932_v34  ;;  %v931_v36 = vmul.f32 0.6931472, %v1232_v35 }
 0x501   :  { %v933_v37 = vsub.f32 %v917_v24, %v931_v36 }
 0x503   :  { %935 = vst.msk [vmem:[#allocation5 + $0x8] sm:$0xff] %vm909_vm4, %v933_v37 }
 0x504   :  { %1266 = shalt.err (!%p1263_p12)
}
 0x505   :  { %s1267_s17 = scalar_lea.hbm %s1497_s9, 256 }
 0x506   :  { %p1268_p13 = scmp.ne.s32.totalorder %s1497_s9, %s1267_s17  ;;  %p1271_p0 = scmp.lt.u32.totalorder %s1267_s17, %s1497_s9 }
 0x508   :  { %p1273_p1 = pnand %p1271_p0, %p1268_p13 }
 0x50a   :  { %1276 = shalt.err (!%p1273_p1)
}
 0x50b   :  { %s1287_s22 = smov 128   ;;  %s1288_s1 = smov 8  }
 0x50c   :  { %947 = dma.vmem_to_hbm [thread:$0]  %s942_s7, 256, %s1497_s9, [#allocation4], %s1287_s22, %s1287_s22, %s1288_s1  }
 0x50d   :  { %1279 = dma.done.wait [#allocation4], 256  }
 0x50e   :  { %1280 = vsyncadd [#allocation4], 4294967040 }
 0x50f   :  { %951 = vsyncpa [#allocation3], 1 }
 0x510   :  { %952 = vsyncpa [#allocation4], 1 }

</bundles_post_ra>
